<compile_context>
chip_gen: v7x
topology: tpu7x:2x2x1
jax: 0.10.0
libtpu: 0.0.40
codegen_flags: <defaults>
</compile_context>

<pallas_src>
import jax
import jax.numpy as jnp
from jax.experimental import pallas as pl
from jax.experimental.pallas import tpu as pltpu


def _parallel_mlp_kernel(x_ref, w1_ref, b1_ref, w2_ref, b2_ref, out_ref):
    # x_ref:  (TB, D) f32|bf16   w1_ref: (D, 2H) bf16    b1_ref: (1, 2H) f32
    # w2_ref: (2H, O1+O2) bf16   b2_ref: (1, O1+O2) f32  out_ref: (TB, O1+O2) f32
    x = x_ref[...].astype(jnp.bfloat16)

    # Fused first layer of both branches: one full-width (D -> 128) matmul.
    h = jnp.dot(x, w1_ref[...], preferred_element_type=jnp.float32) + b1_ref[...]
    h = jnp.maximum(h, 0.0)

    # Fused second layer: block-diagonal (128 -> 30) matmul == implicit concat.
    y = jnp.dot(h.astype(jnp.bfloat16), w2_ref[...],
                preferred_element_type=jnp.float32) + b2_ref[...]
    out_ref[...] = y.astype(out_ref.dtype)


def pack_params(params):
    """Pack the two-branch parameters into fused kernel operands. Call once."""
    (w1a, b1a, w2a, b2a, w1b, b1b, w2b, b2b) = params
    D, H = w1a.shape
    O1 = w2a.shape[1]
    O2 = w2b.shape[1]

    # First layer: side-by-side concat along the output (lane) axis, bf16.
    w1 = jnp.concatenate([w1a, w1b], axis=1).astype(jnp.bfloat16)   # (D, 2H)
    b1 = jnp.concatenate([b1a, b1b], axis=1).astype(jnp.float32)    # (1, 2H)

    # Second layer: block-diagonal so one matmul emits [y1 | y2] directly.
    w2 = jnp.zeros((2 * H, O1 + O2), jnp.float32)
    w2 = w2.at[:H, :O1].set(w2a)
    w2 = w2.at[H:, O1:].set(w2b)                                    # (2H, O1+O2)
    w2 = w2.astype(jnp.bfloat16)
    b2 = jnp.concatenate([b2a, b2b], axis=1).astype(jnp.float32)    # (1, O1+O2)
    return (w1, b1, w2, b2)


def _round_up(x, m):
    return ((x + m - 1) // m) * m


def parallel_modul_forward(x_nchw, packed_params, *, block_b=1024):
    """x_nchw: (B, C, H, W) float32 (or bfloat16). Returns (B, 30) float32."""
    B = x_nchw.shape[0]
    x_flat = x_nchw.reshape(B, -1)  # nn.Flatten(); free layout change

    w1, b1, w2, b2 = packed_params
    D = x_flat.shape[1]
    H2 = w1.shape[1]        # 128
    O = w2.shape[1]         # 30

    # Batch tiling without any padding copy:
    #  - tiny batches: one full-batch block (block dim == array dim is legal).
    #  - otherwise: TB is a multiple of 8 and the grid has >= 2 steps so the
    #    "parallel" batch axis can shard across TensorCores; the ragged final
    #    block (if any) is masked by Pallas (OOB writes dropped).
    if B < 16:
        TB = B
        n_blk = 1
    else:
        TB = min(block_b, _round_up(pl.cdiv(B, 2), 8))
        n_blk = pl.cdiv(B, TB)

    x_isz = jnp.dtype(x_flat.dtype).itemsize
    weight_bytes = (D * H2 * 2 + H2 * 4 + H2 * O * 2 + O * 4)
    vmem_bytes = (2 * TB * D * x_isz        # double-buffered x tiles
                  + TB * D * 2              # in-kernel bf16 cast temp
                  + TB * H2 * 4             # hidden activations
                  + 2 * TB * O * 4          # double-buffered out tiles
                  + 2 * weight_bytes        # resident packed weights
                  + (4 << 20))              # headroom
    vmem_limit = int(min(vmem_bytes, 64 << 20))

    cost = pl.CostEstimate(
        flops=2 * B * D * H2 + 2 * B * H2 * O,
        transcendentals=0,
        bytes_accessed=B * D * x_isz + B * O * 4 + weight_bytes,
    )

    out = pl.pallas_call(
        _parallel_mlp_kernel,
        out_shape=jax.ShapeDtypeStruct((B, O), jnp.float32),
        grid=(n_blk,),
        in_specs=[
            pl.BlockSpec((TB, D), lambda i: (i, 0)),    # x: batch-tiled
            pl.BlockSpec((D, H2), lambda i: (0, 0)),    # packed W1 (resident)
            pl.BlockSpec((1, H2), lambda i: (0, 0)),    # packed b1
            pl.BlockSpec((H2, O), lambda i: (0, 0)),    # block-diag W2
            pl.BlockSpec((1, O), lambda i: (0, 0)),     # packed b2
        ],
        out_specs=pl.BlockSpec((TB, O), lambda i: (i, 0)),
        compiler_params=pltpu.CompilerParams(
            dimension_semantics=("parallel",),
            vmem_limit_bytes=vmem_limit),
        cost_estimate=cost,
    )(x_flat, w1, b1, w2, b2)

    return out


def init_params(key, in_features, hidden=64, out1=20, out2=10):
    """Deterministic init mimicking the nn.Linear shapes of net1 / net2.
    Weights stored as (in, out)."""
    ks = jax.random.split(key, 8)

    def linear(kw, kb, fan_in, fan_out):
        bound = 1.0 / jnp.sqrt(fan_in)
        w = jax.random.uniform(kw, (fan_in, fan_out), jnp.float32, -bound, bound)
        b = jax.random.uniform(kb, (1, fan_out), jnp.float32, -bound, bound)
        return w, b

    w1a, b1a = linear(ks[0], ks[1], in_features, hidden)
    w2a, b2a = linear(ks[2], ks[3], hidden, out1)
    w1b, b1b = linear(ks[4], ks[5], in_features, hidden)
    w2b, b2b = linear(ks[6], ks[7], hidden, out2)
    return (w1a, b1a, w2a, b2a, w1b, b1b, w2b, b2b)


if __name__ == "__main__":
    key = jax.random.PRNGKey(0)
    k_x, k_p = jax.random.split(key)

    B, C, Himg, Wimg = 2, 4, 16, 16          # NCHW input, flattened dim = 1024
    x = jax.random.normal(k_x, (B, C, Himg, Wimg), dtype=jnp.float32)

    params = init_params(k_p, in_features=C * Himg * Wimg)
    packed = pack_params(params)             # one-time packing (outside forward)

    out = parallel_modul_forward(x, packed)
    out = jax.block_until_ready(out)

    # Sanity: shape must match torch.cat((net1(x), net2(x)), dim=1) -> (B, 30)
    assert out.shape == (B, 30), out.shape

    # Cross-check against a plain-JAX f32 reference of the same math.
    # (Kernel uses bf16 MXU contractions with f32 accumulation -> loose tol.)
    xf = x.reshape(B, -1)
    (w1a, b1a, w2a, b2a, w1b, b1b, w2b, b2b) = params
    y1 = jnp.maximum(xf @ w1a + b1a, 0.0) @ w2a + b2a
    y2 = jnp.maximum(xf @ w1b + b1b, 0.0) @ w2b + b2b
    ref = jnp.concatenate([y1, y2], axis=1)
    assert jnp.allclose(out, ref, atol=2e-2, rtol=2e-2), (
        jnp.max(jnp.abs(out - ref)))

    # Also exercise the multi-block / ragged-batch path once (no padding copy).
    Bb = 37
    xb = jax.random.normal(k_x, (Bb, C, Himg, Wimg), dtype=jnp.float32)
    outb = jax.block_until_ready(parallel_modul_forward(xb, packed, block_b=16))
    xbf = xb.reshape(Bb, -1)
    y1b = jnp.maximum(xbf @ w1a + b1a, 0.0) @ w2a + b2a
    y2b = jnp.maximum(xbf @ w1b + b1b, 0.0) @ w2b + b2b
    refb = jnp.concatenate([y1b, y2b], axis=1)
    assert outb.shape == (Bb, 30), outb.shape
    assert jnp.allclose(outb, refb, atol=2e-2, rtol=2e-2), (
        jnp.max(jnp.abs(outb - refb)))

    print("KERNEL_OK")
</pallas_src>

<mosaic_0001>
module attributes {stable_mosaic.version = 11 : i64} {
  func.func @_parallel_mlp_kernel(%arg0: i32, %arg1: memref<2x1024xf32, #tpu.memory_space<vmem>>, %arg2: memref<1024x128xbf16, #tpu.memory_space<vmem>>, %arg3: memref<1x128xf32, #tpu.memory_space<vmem>>, %arg4: memref<128x30xbf16, #tpu.memory_space<vmem>>, %arg5: memref<1x30xf32, #tpu.memory_space<vmem>>, %arg6: memref<2x30xf32, #tpu.memory_space<vmem>>) attributes {dimension_semantics = [#tpu.dimension_semantics<parallel>], iteration_bounds = array<i64: 1>, scalar_prefetch = 0 : i64, scratch_operands = 0 : i64, tpu.core_type = #tpu.core_type<tc>, window_params = [{transform_indices = @transform_0, window_bounds = array<i64: 2, 1024>}, {pipeline_mode = #tpu.pipeline_mode<synchronous>, transform_indices = @transform_1, window_bounds = array<i64: 1024, 128>}, {pipeline_mode = #tpu.pipeline_mode<synchronous>, transform_indices = @transform_2, window_bounds = array<i64: 1, 128>}, {pipeline_mode = #tpu.pipeline_mode<synchronous>, transform_indices = @transform_3, window_bounds = array<i64: 128, 30>}, {pipeline_mode = #tpu.pipeline_mode<synchronous>, transform_indices = @transform_4, window_bounds = array<i64: 1, 30>}, {transform_indices = @transform_5, window_bounds = array<i64: 2, 30>}]} {
    %c0 = arith.constant 0 : index
    %c0_0 = arith.constant 0 : index
    %0 = vector.load %arg1[%c0, %c0_0] : memref<2x1024xf32, #tpu.memory_space<vmem>>, vector<2x1024xf32>
    %1 = arith.truncf %0 : vector<2x1024xf32> to vector<2x1024xbf16>
    %c0_1 = arith.constant 0 : index
    %c0_2 = arith.constant 0 : index
    %2 = vector.load %arg2[%c0_1, %c0_2] : memref<1024x128xbf16, #tpu.memory_space<vmem>>, vector<1024x128xbf16>
    %cst = arith.constant dense<0.000000e+00> : vector<2x128xf32>
    %3 = tpu.matmul %1, %2, %cst {dimension_numbers = #tpu.dot_dimension_numbers<[1], [0], [0], [1], [0, 0, 1, 1], [], []>} : vector<2x1024xbf16>, vector<1024x128xbf16>, vector<2x128xf32> -> vector<2x128xf32>
    %c0_3 = arith.constant 0 : index
    %c0_4 = arith.constant 0 : index
    %4 = vector.load %arg3[%c0_3, %c0_4] : memref<1x128xf32, #tpu.memory_space<vmem>>, vector<1x128xf32>
    %5 = vector.broadcast %4 : vector<1x128xf32> to vector<2x128xf32>
    %6 = arith.addf %3, %5 : vector<2x128xf32>
    %cst_5 = arith.constant 0.000000e+00 : f32
    %7 = vector.broadcast %cst_5 : f32 to vector<2x128xf32>
    %8 = arith.maximumf %6, %7 : vector<2x128xf32>
    %9 = arith.truncf %8 : vector<2x128xf32> to vector<2x128xbf16>
    %c0_6 = arith.constant 0 : index
    %c0_7 = arith.constant 0 : index
    %10 = vector.load %arg4[%c0_6, %c0_7] : memref<128x30xbf16, #tpu.memory_space<vmem>>, vector<128x30xbf16>
    %cst_8 = arith.constant dense<0.000000e+00> : vector<2x30xf32>
    %11 = tpu.matmul %9, %10, %cst_8 {dimension_numbers = #tpu.dot_dimension_numbers<[1], [0], [0], [1], [0, 0, 1, 1], [], []>} : vector<2x128xbf16>, vector<128x30xbf16>, vector<2x30xf32> -> vector<2x30xf32>
    %c0_9 = arith.constant 0 : index
    %c0_10 = arith.constant 0 : index
    %12 = vector.load %arg5[%c0_9, %c0_10] : memref<1x30xf32, #tpu.memory_space<vmem>>, vector<1x30xf32>
    %13 = vector.broadcast %12 : vector<1x30xf32> to vector<2x30xf32>
    %14 = arith.addf %11, %13 : vector<2x30xf32>
    %c0_11 = arith.constant 0 : index
    %c0_12 = arith.constant 0 : index
    %15 = vector.load %arg6[%c0_11, %c0_12] : memref<2x30xf32, #tpu.memory_space<vmem>>, vector<2x30xf32>
    tpu.vector_store %arg6[%c0_11, %c0_12], %14 {strides = array<i32>} : memref<2x30xf32, #tpu.memory_space<vmem>>, vector<2x30xf32>,
    return
  }
  func.func @transform_0(%arg0: i32) -> (i32, i32) {
    %c0_i32 = arith.constant 0 : i32
    %c0_i32_0 = arith.constant 0 : i32
    return %arg0, %c0_i32 : i32, i32
  }
  func.func @transform_1(%arg0: i32) -> (i32, i32) {
    %c0_i32 = arith.constant 0 : i32
    %c0_i32_0 = arith.constant 0 : i32
    %c0_i32_1 = arith.constant 0 : i32
    return %c0_i32, %c0_i32_0 : i32, i32
  }
  func.func @transform_2(%arg0: i32) -> (i32, i32) {
    %c0_i32 = arith.constant 0 : i32
    %c0_i32_0 = arith.constant 0 : i32
    %c0_i32_1 = arith.constant 0 : i32
    return %c0_i32, %c0_i32_0 : i32, i32
  }
  func.func @transform_3(%arg0: i32) -> (i32, i32) {
    %c0_i32 = arith.constant 0 : i32
    %c0_i32_0 = arith.constant 0 : i32
    %c0_i32_1 = arith.constant 0 : i32
    return %c0_i32, %c0_i32_0 : i32, i32
  }
  func.func @transform_4(%arg0: i32) -> (i32, i32) {
    %c0_i32 = arith.constant 0 : i32
    %c0_i32_0 = arith.constant 0 : i32
    %c0_i32_1 = arith.constant 0 : i32
    return %c0_i32, %c0_i32_0 : i32, i32
  }
  func.func @transform_5(%arg0: i32) -> (i32, i32) {
    %c0_i32 = arith.constant 0 : i32
    %c0_i32_0 = arith.constant 0 : i32
    return %arg0, %c0_i32 : i32, i32
  }
}

</mosaic_0001>

<bundles_post_ra>
// kernel: tpu_custom_call.1
= control target key start
LH: loop header
LB: loop body
LE: loop exit
PB: predicated region body
PF: predicated region fallthrough
CT: control target
= control target key end

     0   :  { %10 = vsyncpa [#allocation3], 0  ;;  %s1322_s0 = inlined_call_operand.vmem [shape: f32[2,1024], index: 0, kind: input, shape index: {}]   ;;  %s1323_s1 = inlined_call_operand.hbm [shape: bf16[1024,128], index: 1, kind: input, shape index: {}]   ;;  %s1324_s2 = inlined_call_operand.vmem [shape: f32[1,128], index: 2, kind: input, shape index: {}]   ;;  %s1325_s3 = inlined_call_operand.vmem [shape: bf16[128,30], index: 3, kind: input, shape index: {}]   ;;  %s1326_s4 = inlined_call_operand.vmem [shape: f32[1,30], index: 4, kind: input, shape index: {}]   ;;  %s1327_s5 = inlined_call_operand.hbm [shape: f32[2,30], index: 5, kind: output, shape index: {}]  }
   0x1   :  { %11 = vsyncpa [#allocation4], 0  ;;  %s1219_s18 = smov [#allocation2]   ;;  %s1171_s22 = scalar_lea.hbm %s1323_s1, 8192 }
   0x2   :  { %s19_s19 = sshll.u32 %s1219_s18, 4  ;;  %p1172_p0 = scmp.ne.s32.totalorder %s1323_s1, %s1171_s22  ;;  %s20_s19 = int_to_ptr.vmem [resolvable:$true] %s19_s19 }
   0x3   :  { %p1175_p1 = scmp.lt.u32.totalorder %s1171_s22, %s1323_s1 }
   0x5   :  { %p1177_p2 = pnand %p1175_p1, %p1172_p0 }
   0x7   :  { %1180 = shalt.err (!%p1177_p2)
}
   0x8   :  { %s1181_s27 = scalar_lea.vmem %s20_s19, 8192  ;;  %p1186_p4 = scmp.lt.s32.totalorder %s20_s19, %s20_s19 }
   0x9   :  { %p1182_p3 = scmp.ne.s32.totalorder %s20_s19, %s1181_s27  ;;  %p1187_p5 = scmp.lt.s32.totalorder %s1181_s27, %s1181_s27 }
   0xb   :  { %p1188_p6 = por %p1187_p5, %p1186_p4 }
   0xd   :  { %p1189_p7 = pnand %p1188_p6, %p1182_p3 }
   0xf   :  { %1192 = shalt.err (!%p1189_p7)
}
  0x10   :  { %s1220_s28 = smov 64   ;;  %s1221_s29 = smov 4  }
  0x11   :  { %25 = dma.hbm_to_vmem [thread:$0]  %s1323_s1, 8192, %s20_s19, [#allocation3], %s1220_s28, %s1220_s28, %s1221_s29  }
  0x12   :  { %1215 = dma.done.wait [#allocation3], 8192  }
  0x13   :  { %1216 = vsyncadd [#allocation3], 4294959104  ;;  %v1097_v0 = vld [vmem:[#allocation2 + $0x40] sm:$0xff]   ;;  %v1101_v4 = vld [vmem:[#allocation2 + $0x48] sm:$0xff]   ;;  %v1222_v22 = vmov 1983009808   ;;  %v44_v24 = vlaneseq }
  0x14   :  { %v1098_v1 = vld [vmem:[#allocation2 + $0xc0] sm:$0xff]   ;;  %973 = vmatprep.subr.bf16.mxu0 %v1097_v0  ;;  %v1102_v5 = vld [vmem:[#allocation2 + $0xc8] sm:$0xff]   ;;  %v1105_v8 = vld [vmem:[#allocation2 + $0x50] sm:$0xff]   ;;  %v42_v23 = vunpack.c.l.s4 %v1222_v22  ;;  %vm1224_vm0 = vmmov 0   ;;  %s1225_s27 = smov [#allocation5]   ;;  %vm882_vm1 = vcmask 238592  }
  0x15   :  { %v1099_v2 = vld [vmem:[#allocation2] sm:$0xff]   ;;  %995 = vmatprep.subr.bf16.mxu1 %v1098_v1  ;;  %v1103_v6 = vld [vmem:[#allocation2 + $0x8] sm:$0xff]   ;;  %v1106_v9 = vld [vmem:[#allocation2 + $0xd0] sm:$0xff]   ;;  %v45_v30 = vshrl.u32 %v44_v24, 7  ;;  %s890_s28 = sshll.u32 %s1225_s27, 4  ;;  %s891_s28 = int_to_ptr.vmem [resolvable:$true] %s890_s28 }
  0x16   :  { %v1100_v3 = vld [vmem:[#allocation2 + $0x80] sm:$0xff]   ;;  %974 = vmatpush3.bf16.msra.mxu0 %v1099_v2  ;;  %v1104_v7 = vld [vmem:[#allocation2 + $0x88] sm:$0xff]   ;;  %v1107_v10 = vld [vmem:[#allocation2 + $0x10] sm:$0xff]   ;;  %v43_v29 = vunpack.c.0.s8 %v42_v23  ;;  %s1193_s29 = scalar_lea.vmem %s891_s28, 32  ;;  %p1198_p9 = scmp.lt.s32.totalorder %s891_s28, %s891_s28 }
  0x17   :  { %996 = vmatpush3.bf16.msra.mxu1 %v1100_v3  ;;  %975 = vmatprep.subr.bf16.mxu0 %v1101_v4  ;;  %v1108_v11 = vld [vmem:[#allocation2 + $0x90] sm:$0xff]   ;;  %v1109_v12 = vld [vmem:[#allocation2 + $0x58] sm:$0xff]   ;;  %v1113_v16 = vld [vmem:[#allocation2 + $0x60] sm:$0xff]   ;;  %p1194_p8 = scmp.ne.s32.totalorder %s891_s28, %s1193_s29  ;;  %p1199_p10 = scmp.lt.s32.totalorder %s1193_s29, %s1193_s29 }
  0x18   :  { %997 = vmatprep.subr.bf16.mxu1 %v1102_v5  ;;  %v1110_v13 = vld [vmem:[#allocation2 + $0xd8] sm:$0xff]   ;;  %v1114_v17 = vld [vmem:[#allocation2 + $0xe0] sm:$0xff]   ;;  %v1117_v20 = vld [vmem:[#allocation2 + $0x68] sm:$0xff]   ;;  %v1268_v35 = vsub.s32 %v43_v29, %v45_v30 }
  0x19   :  { %v1111_v14 = vld [vmem:[#allocation2 + $0x18] sm:$0xff]   ;;  %v1115_v18 = vld [vmem:[#allocation2 + $0x20] sm:$0xff]   ;;  %v1118_v21 = vld [vmem:[#allocation2 + $0xe8] sm:$0xff]   ;;  %p1200_p11 = por %p1199_p10, %p1198_p9 }
  0x1a   :  { %976 = vmatpush3.bf16.msra.mxu0 %v1103_v6  ;;  %v1112_v15 = vld [vmem:[#allocation2 + $0x98] sm:$0xff]   ;;  %v1116_v19 = vld [vmem:[#allocation2 + $0xa0] sm:$0xff]   ;;  %v1119_v25 = vld [vmem:[#allocation2 + $0x28] sm:$0xff]  }
  0x1b   :  { %998 = vmatpush3.bf16.msra.mxu1 %v1104_v7  ;;  %977 = vmatprep.subr.bf16.mxu0 %v1105_v8  ;;  %v1120_v26 = vld [vmem:[#allocation2 + $0xa8] sm:$0xff]   ;;  %v1121_v27 = vld [vmem:[#allocation2 + $0x70] sm:$0xff]   ;;  %v1125_v33 = vld [vmem:[#allocation2 + $0x78] sm:$0xff]   ;;  %p1201_p12 = pnand %p1200_p11, %p1194_p8 }
  0x1c   :  { %999 = vmatprep.subr.bf16.mxu1 %v1106_v9  ;;  %v1122_v28 = vld [vmem:[#allocation2 + $0xf0] sm:$0xff]   ;;  %v1126_v34 = vld [vmem:[#allocation2 + $0xf8] sm:$0xff]   ;;  %v36_v38 = vld [vmem:[%s1322_s0] sm:$0xff] }
  0x1d   :  { %v1123_v31 = vld [vmem:[#allocation2 + $0x30] sm:$0xff]   ;;  %v1127_v36 = vld [vmem:[#allocation2 + $0x38] sm:$0xff]   ;;  %v47_v39 = vrot.slane %v36_v38, %v1268_v35  ;;  %v40_v40 = vcombine.high %v36_v38, %v36_v38  ;;  %v1130_v41 = vld [vmem:[#allocation2 + $0x140] sm:$0xff]  }
  0x1e   :  { %978 = vmatpush3.bf16.msra.mxu0 %v1107_v10  ;;  %v1124_v32 = vld [vmem:[#allocation2 + $0xb0] sm:$0xff]   ;;  %v1128_v37 = vld [vmem:[#allocation2 + $0xb8] sm:$0xff]   ;;  %v1131_v42 = vld [vmem:[#allocation2 + $0x1c0] sm:$0xff]  }
  0x1f   :  { %1000 = vmatpush3.bf16.msra.mxu1 %v1108_v11  ;;  %979 = vmatprep.subr.bf16.mxu0 %v1109_v12  ;;  %v55_v43 = vcombine.high %v47_v39, %v47_v39  ;;  %v54_v44 = vrot.slane %v40_v40, %v1268_v35  ;;  %v82_v45 = vpack.c.bf16 %v47_v39, %v47_v39  ;;  %v1132_v46 = vld [vmem:[#allocation2 + $0x100] sm:$0xff]   ;;  %v1134_v51 = vld [vmem:[#allocation2 + $0x148] sm:$0xff]   ;;  %v1138_v56 = vld [vmem:[#allocation2 + $0x150] sm:$0xff]  }
  0x20   :  { %1001 = vmatprep.subr.bf16.mxu1 %v1110_v13  ;;  %v1133_v49 = vld [vmem:[#allocation2 + $0x180] sm:$0xff]   ;;  %v1135_v53 = vld [vmem:[#allocation2 + $0x1c8] sm:$0xff]   ;;  %v1139_v57 = vld [vmem:[#allocation2 + $0x1d0] sm:$0xff]  }
  0x21   :  { %v83_v47 = vpack.c.bf16 %v55_v43, %v55_v43  ;;  %v56_v48 = vcombine.high %v54_v44, %v54_v44  ;;  %v84_v50 = vpack.c.bf16 %v54_v44, %v54_v44  ;;  %v1136_v54 = vld [vmem:[#allocation2 + $0x108] sm:$0xff]   ;;  %v1140_v58 = vld [vmem:[#allocation2 + $0x110] sm:$0xff]   ;;  %v1142_v60 = vld [vmem:[#allocation2 + $0x158] sm:$0xff]  }
  0x22   :  { %980 = vmatpush3.bf16.msra.mxu0 %v1111_v14  ;;  %v1137_v55 = vld [vmem:[#allocation2 + $0x188] sm:$0xff]   ;;  %v1141_v59 = vld [vmem:[#allocation2 + $0x190] sm:$0xff]   ;;  %v1143_v61 = vld [vmem:[#allocation2 + $0x1d8] sm:$0xff]  }
  0x23   :  { %1002 = vmatpush3.bf16.msra.mxu1 %v1112_v15  ;;  %981 = vmatprep.subr.bf16.mxu0 %v1113_v16  ;;  %v85_v52 = vpack.c.bf16 %v56_v48, %v56_v48  ;;  %v1144_v62 = vld [vmem:[#allocation2 + $0x118] sm:$0xff]   ;;  %v1146_v0 = vld [vmem:[#allocation2 + $0x160] sm:$0xff]   ;;  %v1150_v4 = vld [vmem:[#allocation2 + $0x168] sm:$0xff]  }
  0x24   :  { %1003 = vmatprep.subr.bf16.mxu1 %v1114_v17  ;;  %641 = vmatprep.mubr.bf16.mxu0 %v83_v47  ;;  %v1145_v63 = vld [vmem:[#allocation2 + $0x198] sm:$0xff]   ;;  %v1147_v1 = vld [vmem:[#allocation2 + $0x1e0] sm:$0xff]   ;;  %v1151_v5 = vld [vmem:[#allocation2 + $0x1e8] sm:$0xff]  }
  0x25   :  { %681 = vmatprep.mubr.bf16.mxu1 %v85_v52  ;;  %v1148_v2 = vld [vmem:[#allocation2 + $0x120] sm:$0xff]   ;;  %v1152_v6 = vld [vmem:[#allocation2 + $0x128] sm:$0xff]   ;;  %v1154_v8 = vld [vmem:[#allocation2 + $0x170] sm:$0xff]  }
  0x26   :  { %982 = vmatpush3.bf16.msra.mxu0 %v1115_v18  ;;  %v1149_v3 = vld [vmem:[#allocation2 + $0x1a0] sm:$0xff]   ;;  %v1153_v7 = vld [vmem:[#allocation2 + $0x1a8] sm:$0xff]   ;;  %v1155_v9 = vld [vmem:[#allocation2 + $0x1f0] sm:$0xff]  }
  0x27   :  { %1004 = vmatpush3.bf16.msra.mxu1 %v1116_v19  ;;  %983 = vmatprep.subr.bf16.mxu0 %v1117_v20  ;;  %v1156_v10 = vld [vmem:[#allocation2 + $0x130] sm:$0xff]   ;;  %v1158_v12 = vld [vmem:[#allocation2 + $0x178] sm:$0xff]   ;;  %v37_v15 = vld [vmem:[%s1322_s0 + $0x8] sm:$0xff] }
  0x28   :  { %1005 = vmatprep.subr.bf16.mxu1 %v1118_v21  ;;  %v1157_v11 = vld [vmem:[#allocation2 + $0x1b0] sm:$0xff]   ;;  %v1159_v13 = vld [vmem:[#allocation2 + $0x1f8] sm:$0xff]   ;;  %v64_v17 = vrot.slane %v37_v15, %v1268_v35  ;;  %v57_v18 = vcombine.high %v37_v15, %v37_v15 }
  0x29   :  { %v1160_v14 = vld [vmem:[#allocation2 + $0x138] sm:$0xff]   ;;  %v1165_v29 = vld [vmem:[%s1325_s3 + $0x10] sm:$0xff]  }
  0x2a   :  { %984 = vmatpush3.bf16.msra.mxu0 %v1119_v25  ;;  %v1161_v16 = vld [vmem:[#allocation2 + $0x1b8] sm:$0xff]   ;;  %v72_v19 = vcombine.high %v64_v17, %v64_v17  ;;  %v71_v20 = vrot.slane %v57_v18, %v1268_v35  ;;  %v86_v21 = vpack.c.bf16 %v64_v17, %v64_v17 }
  0x2b   :  { %1006 = vmatpush3.bf16.msra.mxu1 %v1120_v26  ;;  %985 = vmatprep.subr.bf16.mxu0 %v1121_v27  ;;  %v1163_v26 = vld [vmem:[%s1325_s3] sm:$0xff]   ;;  %v1223_v27 = vmov 0.0   ;;  %v1166_v30 = vld [vmem:[%s1325_s3 + $0x18] sm:$0xff]  }
  0x2c   :  { %1007 = vmatprep.subr.bf16.mxu1 %v1122_v28  ;;  %v87_v22 = vpack.c.bf16 %v72_v19, %v72_v19  ;;  %v73_v23 = vcombine.high %v71_v20, %v71_v20  ;;  %v88_v24 = vpack.c.bf16 %v71_v20, %v71_v20  ;;  %v1164_v28 = vld [vmem:[%s1325_s3 + $0x8] sm:$0xff]  }
  0x2e   :  { %986 = vmatpush3.bf16.msra.mxu0 %v1123_v31  ;;  %v89_v25 = vpack.c.bf16 %v73_v23, %v73_v23  ;;  %v1167_v31 = vld [vmem:[%s1325_s3 + $0x20] sm:$0xff]  }
  0x2f   :  { %1008 = vmatpush3.bf16.msra.mxu1 %v1124_v32  ;;  %987 = vmatprep.subr.bf16.mxu0 %v1125_v33  ;;  %v1168_v32 = vld [vmem:[%s1325_s3 + $0x28] sm:$0xff]   ;;  %v1169_v33 = vld [vmem:[%s1325_s3 + $0x30] sm:$0xff]  }
  0x30   :  { %1009 = vmatprep.subr.bf16.mxu1 %v1126_v34  ;;  %v1170_v34 = vld [vmem:[%s1325_s3 + $0x38] sm:$0xff]  }
  0x32   :  { %988 = vmatpush3.bf16.msra.mxu0 %v1127_v36  ;;  %v899_v36 = vld [vmem:[%s1324_s2] ss:$0 sm:$0xff] }
  0x33   :  { %1010 = vmatpush3.bf16.msra.mxu1 %v1128_v37  ;;  %1017 = vmatprep.subr.bf16.mxu0 %v1130_v41 }
  0x34   :  { %1039 = vmatprep.subr.bf16.mxu1 %v1131_v42 }
  0x35   :  { %642 = vmatmul.mubr.bf16.vlgmr.msra.gmra.mrb[0].mxu0 %v82_v45 }
  0x36   :  { %1018 = vmatpush3.bf16.msra.mxu0 %v1132_v46  ;;  %682 = vmatmul.mubr.bf16.vlgmr.msra.gmra.mrb[0].mxu1 %v84_v50 }
  0x37   :  { %1019 = vmatprep.subr.bf16.mxu0 %v1134_v51  ;;  %1040 = vmatpush3.bf16.msra.mxu1 %v1133_v49 }
  0x38   :  { %1041 = vmatprep.subr.bf16.mxu1 %v1135_v53  ;;  %721 = vmatprep.mubr.bf16.mxu0 %v87_v22 }
  0x39   :  { %761 = vmatprep.mubr.bf16.mxu1 %v89_v25 }
  0x3a   :  { %1020 = vmatpush3.bf16.msra.mxu0 %v1136_v54 }
  0x3b   :  { %1021 = vmatprep.subr.bf16.mxu0 %v1138_v56  ;;  %1042 = vmatpush3.bf16.msra.mxu1 %v1137_v55 }
  0x3c   :  { %1043 = vmatprep.subr.bf16.mxu1 %v1139_v57 }
  0x3e   :  { %1022 = vmatpush3.bf16.msra.mxu0 %v1140_v58 }
  0x3f   :  { %1023 = vmatprep.subr.bf16.mxu0 %v1142_v60  ;;  %1044 = vmatpush3.bf16.msra.mxu1 %v1141_v59 }
  0x40   :  { %1045 = vmatprep.subr.bf16.mxu1 %v1143_v61 }
  0x42   :  { %1024 = vmatpush3.bf16.msra.mxu0 %v1144_v62  ;;  %v964_v62 = vld [vmem:[%s1326_s4] ss:$0 sm:$0xff] }
  0x43   :  { %1025 = vmatprep.subr.bf16.mxu0 %v1146_v0  ;;  %1046 = vmatpush3.bf16.msra.mxu1 %v1145_v63 }
  0x44   :  { %1047 = vmatprep.subr.bf16.mxu1 %v1147_v1 }
  0x46   :  { %1026 = vmatpush3.bf16.msra.mxu0 %v1148_v2 }
  0x47   :  { %1027 = vmatprep.subr.bf16.mxu0 %v1150_v4  ;;  %1048 = vmatpush3.bf16.msra.mxu1 %v1149_v3 }
  0x48   :  { %1049 = vmatprep.subr.bf16.mxu1 %v1151_v5 }
  0x4a   :  { %1028 = vmatpush3.bf16.msra.mxu0 %v1152_v6 }
  0x4b   :  { %1029 = vmatprep.subr.bf16.mxu0 %v1154_v8  ;;  %1050 = vmatpush3.bf16.msra.mxu1 %v1153_v7 }
  0x4c   :  { %1051 = vmatprep.subr.bf16.mxu1 %v1155_v9 }
  0x4e   :  { %1030 = vmatpush3.bf16.msra.mxu0 %v1156_v10 }
  0x4f   :  { %1031 = vmatprep.subr.bf16.mxu0 %v1158_v12  ;;  %1052 = vmatpush3.bf16.msra.mxu1 %v1157_v11 }
  0x50   :  { %1053 = vmatprep.subr.bf16.mxu1 %v1159_v13 }
  0x52   :  { %1032 = vmatpush3.bf16.msra.mxu0 %v1160_v14 }
  0x53   :  { %1054 = vmatpush3.bf16.msra.mxu1 %v1161_v16  ;;  %1070 = vmatprep.subr.bf16.mxu0 %v1223_v27 }
  0x55   :  { %722 = vmatmul.mubr.bf16.vlgmr.msra.gmra.mrb[4].mxu0 %v86_v21 }
  0x56   :  { %762 = vmatmul.mubr.bf16.vlgmr.msra.gmra.mrb[4].mxu1 %v88_v24  ;;  %1071 = vmatpush3.bf16.msra.mxu0 %v1163_v26 }
  0x57   :  { %1072 = vmatprep.subr.bf16.mxu0 %v1223_v27  ;;  %1086 = vmatprep.mubr.msk.bf16.mxu0 %vm1224_vm0, %v1223_v27 }
  0x5a   :  { %1073 = vmatpush3.bf16.msra.mxu0 %v1164_v28 }
  0x5b   :  { %1074 = vmatprep.subr.bf16.mxu0 %v1223_v27 }
  0x5e   :  { %1075 = vmatpush3.bf16.msra.mxu0 %v1165_v29 }
  0x5f   :  { %1076 = vmatprep.subr.bf16.mxu0 %v1223_v27 }
  0x62   :  { %1077 = vmatpush3.bf16.msra.mxu0 %v1166_v30 }
  0x63   :  { %1078 = vmatprep.subr.bf16.mxu0 %v1223_v27 }
  0x66   :  { %1079 = vmatpush3.bf16.msra.mxu0 %v1167_v31 }
  0x67   :  { %1080 = vmatprep.subr.bf16.mxu0 %v1223_v27 }
  0x6a   :  { %1081 = vmatpush3.bf16.msra.mxu0 %v1168_v32 }
  0x6b   :  { %1082 = vmatprep.subr.bf16.mxu0 %v1223_v27 }
  0x6e   :  { %1083 = vmatpush3.bf16.msra.mxu0 %v1169_v33 }
  0x6f   :  { %1084 = vmatprep.subr.bf16.mxu0 %v1223_v27 }
  0x72   :  { %1085 = vmatpush3.bf16.msra.mxu0 %v1170_v34 }
 0x108   :  { %v989_v35 = vpop.f32.mrb[0].mxu0 }
 0x109   :  { %v990_v37 = vpop.f32.mrb[1].mxu0  ;;  %v1011_v38 = vpop.f32.mrb[0].mxu1 }
 0x10a   :  { %v991_v39 = vadd.f32 %v990_v37, %v989_v35  ;;  %v992_v40 = vpop.f32.mrb[2].mxu0  ;;  %v1012_v41 = vpop.f32.mrb[1].mxu1 }
 0x10b   :  { %v993_v42 = vpop.f32.mrb[3].mxu0  ;;  %v1013_v44 = vadd.f32 %v1012_v41, %v1011_v38  ;;  %v1014_v45 = vpop.f32.mrb[2].mxu1 }
 0x10c   :  { %v644_v43 = vadd.f32 %v991_v39, %v899_v36  ;;  %v1015_v46 = vpop.f32.mrb[3].mxu1 }
 0x10e   :  { %v684_v47 = vadd.f32 %v1013_v44, %v644_v43 }
 0x128   :  { %v1033_v48 = vpop.f32.mrb[4].mxu0 }
 0x129   :  { %v1034_v49 = vpop.f32.mrb[5].mxu0  ;;  %v1055_v50 = vpop.f32.mrb[4].mxu1 }
 0x12a   :  { %v1035_v51 = vadd.f32 %v1034_v49, %v1033_v48  ;;  %v1036_v52 = vpop.f32.mrb[6].mxu0  ;;  %v1056_v53 = vpop.f32.mrb[5].mxu1 }
 0x12b   :  { %v1037_v54 = vpop.f32.mrb[7].mxu0  ;;  %v1057_v56 = vadd.f32 %v1056_v53, %v1055_v50  ;;  %v1058_v57 = vpop.f32.mrb[6].mxu1 }
 0x12c   :  { %v724_v55 = vadd.f32 %v1035_v51, %v684_v47  ;;  %v1059_v58 = vpop.f32.mrb[7].mxu1 }
 0x12e   :  { %v764_v59 = vadd.f32 %v1057_v56, %v724_v55 }
 0x130   :  { %v769_v60 = vmax.f32 %v764_v59, 0.0 }
 0x132   :  { %v770_v61 = vpack.c.bf16 %v769_v60, %v769_v60 }
 0x134   :  { %1087 = vmatmul.mubr.bf16.vlgmr.msra.gmra.mrb[8].mxu0 %v770_v61 }
 0x207   :  { %v876_v63 = vpop.f32.mrb[8].mxu0 }
 0x208   :  { %v877_v0 = vadd.f32 %v964_v62, %v876_v63  ;;  %v1088_v1 = vpop.f32.mrb[9].mxu0 }
 0x209   :  { %v879_v2 = vpop.f32.mrb[10].mxu0 }
 0x20a   :  { %v1089_v3 = vpop.f32.mrb[11].mxu0  ;;  %883 = vst.msk [vmem:[#allocation5] sm:$0x3] %vm882_vm1, %v877_v0 }
 0x20b   :  { %1204 = shalt.err (!%p1201_p12)
}
 0x20c   :  { %s1205_s4 = scalar_lea.hbm %s1327_s5, 32 }
 0x20d   :  { %p1206_p13 = scmp.ne.s32.totalorder %s1327_s5, %s1205_s4  ;;  %p1209_p0 = scmp.lt.u32.totalorder %s1205_s4, %s1327_s5 }
 0x20f   :  { %p1211_p1 = pnand %p1209_p0, %p1206_p13 }
 0x211   :  { %1214 = shalt.err (!%p1211_p1)
}
 0x212   :  { %893 = dma.vmem_to_hbm [thread:$0]  %s891_s28, 32, %s1327_s5, [#allocation4]  }
 0x213   :  { %1217 = dma.done.wait [#allocation4], 32  }
 0x214   :  { %1218 = vsyncadd [#allocation4], 4294967264 }
 0x215   :  { %897 = vsyncpa [#allocation3], 1 }
 0x216   :  { %898 = vsyncpa [#allocation4], 1 }

</bundles_post_ra>
